<compile_context>
chip_gen: v7x
topology: tpu7x:2x2x1
jax: 0.10.0
libtpu: 0.0.40
codegen_flags: <defaults>
</compile_context>

<pallas_src>
import jax
import jax.numpy as jnp
from jax.experimental import pallas as pl
from jax.experimental.pallas import tpu as pltpu


def _down_kernel(x_ref, w_ref, b_ref, alpha_ref, o_ref):
    # x_ref     : (TR, 2, Wo, 2*C)  TR pooled rows; axis 1 = H-pair;
    #                               lane axis packs (W-pair, channel).
    # w_ref     : (C, 2*C)          1x1-conv weight for right-multiplication.
    # b_ref     : (1, 2*C)          bias row.
    # alpha_ref : (1, 1)            PReLU slope (SMEM scalar).
    # o_ref     : (TR*Wo, 2*C)      flattened NHWC output rows.
    tr, _, wo, two_c = x_ref.shape
    c = two_c // 2

    x = x_ref[...]
    # MaxPool2d(2), H direction: max over the leading pair axis.
    hmax = jnp.maximum(x[:, 0], x[:, 1])                    # (TR, Wo, 2C)
    # MaxPool2d(2), W direction: pair interleaved on lanes as [s*C + c]
    # -> max of two contiguous lane slices.
    pooled = jnp.maximum(hmax[:, :, :c], hmax[:, :, c:])    # (TR, Wo, C)
    pooled = pooled.reshape(tr * wo, c)

    # 1x1 conv == channel matmul on the MXU + bias broadcast.
    y = jnp.dot(pooled, w_ref[...], preferred_element_type=jnp.float32)
    y = y + b_ref[...]

    # Single-parameter PReLU (nn.PReLU() default).
    alpha = alpha_ref[0, 0]
    o_ref[...] = jnp.where(y >= 0.0, y, alpha * y)


def _round_up(x, m):
    return (x + m - 1) // m * m


def _pick_row_tile(rows, wo, c_in, c_out, budget_bytes=6 * 1024 * 1024):
    """Largest divisor of `rows` whose (input + output) block fits the budget.

    Keeps >=2 grid steps when possible (so the DMA pipeline actually overlaps)
    and prefers tiles whose flattened output row count is sublane-aligned.
    """
    def blk_bytes(tr):
        in_b = tr * 2 * _round_up(wo, 8) * _round_up(2 * c_in, 128) * 4
        out_b = _round_up(tr * wo, 8) * _round_up(c_out, 128) * 4
        return in_b + out_b

    divisors = [d for d in range(1, rows + 1) if rows % d == 0]
    candidates = [d for d in divisors
                  if (d < rows or rows == 1) and blk_bytes(d) <= budget_bytes]
    if not candidates:
        candidates = [1]
    aligned = [d for d in candidates if (d * wo) % 8 == 0]
    return max(aligned) if aligned else max(candidates)


def down_forward(x_nchw, w_conv, b_conv, alpha):
    """x_nchw: (N, C, H, W) f32 -> (N, 2C, H//2, W//2) f32."""
    n, c, h, w = x_nchw.shape
    ho, wo = h // 2, w // 2
    c_out = w_conv.shape[0]  # = 2 * c

    # MaxPool2d(2) floors odd spatial dims; crop to the even region
    # (no-op when H and W are already even).
    if h % 2 or w % 2:
        x_nchw = x_nchw[:, :, : 2 * ho, : 2 * wo]

    # One layout pass NCHW -> NHWC so channels sit on the lane axis.
    # TODO(synk): this transpose (and the inverse one below) disappears if the
    # surrounding model is kept channels-last end-to-end.
    x_nhwc = jnp.transpose(x_nchw, (0, 2, 3, 1))

    # Free view (row-major identity, no data movement): (N*Ho, 2, Wo, 2*C).
    xv = x_nhwc.reshape(n * ho, 2, wo, 2 * c)

    # Conv weight (2C, C, 1, 1) -> (C, 2C); bias -> row; alpha -> SMEM scalar.
    w_mat = jnp.transpose(w_conv.reshape(c_out, c), (1, 0))
    b_row = b_conv.reshape(1, c_out)
    # TODO(synk): per-channel PReLU (num_parameters=C_out) would instead pass a
    # (1, C_out) VMEM row and broadcast it in the kernel.
    alpha_arr = jnp.asarray(alpha, jnp.float32).reshape(1, 1)

    rows = n * ho
    tr = _pick_row_tile(rows, wo, c, c_out)
    grid = (rows // tr,)

    out_flat = pl.pallas_call(
        _down_kernel,
        out_shape=jax.ShapeDtypeStruct((rows * wo, c_out), jnp.float32),
        grid=grid,
        in_specs=[
            # Contiguous input block: TR pooled rows of the (2, Wo, 2C) slab.
            pl.BlockSpec((tr, 2, wo, 2 * c), lambda i: (i, 0, 0, 0)),
            # Weight / bias: full blocks, constant index (fetched once).
            pl.BlockSpec((c, c_out), lambda i: (0, 0)),
            pl.BlockSpec((1, c_out), lambda i: (0, 0)),
            # PReLU slope: scalar in SMEM.
            pl.BlockSpec(memory_space=pltpu.MemorySpace.SMEM),
        ],
        out_specs=pl.BlockSpec((tr * wo, c_out), lambda i: (i, 0)),
        compiler_params=pltpu.CompilerParams(
            dimension_semantics=("parallel",),
            vmem_limit_bytes=32 * 1024 * 1024,
        ),
    )(xv, w_mat, b_row, alpha_arr)

    # (N*Ho*Wo, 2C) -> (N, Ho, Wo, 2C) -> NCHW.
    out = out_flat.reshape(n, ho, wo, c_out)
    return jnp.transpose(out, (0, 3, 1, 2))


def _reference(x_nchw, w_conv, b_conv, alpha):
    # Pure-JAX reference of the PyTorch forward for a sanity check.
    n, c, h, w = x_nchw.shape
    ho, wo = h // 2, w // 2
    xr = x_nchw[:, :, : 2 * ho, : 2 * wo].reshape(n, c, ho, 2, wo, 2)
    pooled = xr.max(axis=(3, 5))                             # (N, C, Ho, Wo)
    wm = w_conv.reshape(w_conv.shape[0], c)                  # (2C, C)
    y = jnp.einsum("oc,nchw->nohw", wm, pooled) + b_conv[None, :, None, None]
    return jnp.where(y >= 0, y, alpha * y)


if __name__ == "__main__":
    key = jax.random.PRNGKey(0)
    k_x, k_w, k_b = jax.random.split(key, 3)

    N, C, H, W = 2, 4, 16, 16
    C_OUT = 2 * C

    x = jax.random.normal(k_x, (N, C, H, W), dtype=jnp.float32)
    # Deterministic synthetic parameters (shapes from nn.Conv2d / nn.PReLU).
    w_conv = jax.random.normal(k_w, (C_OUT, C, 1, 1), dtype=jnp.float32) * 0.1
    b_conv = jax.random.normal(k_b, (C_OUT,), dtype=jnp.float32) * 0.1
    alpha = jnp.float32(0.25)  # nn.PReLU() default: one shared parameter

    out = down_forward(x, w_conv, b_conv, alpha)
    out = jax.block_until_ready(out)

    ref = _reference(x, w_conv, b_conv, alpha)
    assert out.shape == (N, C_OUT, H // 2, W // 2), out.shape
    assert jnp.allclose(out, ref, atol=1e-5, rtol=1e-5), "mismatch vs reference"

    print("KERNEL_OK")
</pallas_src>

<mosaic_0001>
module attributes {stable_mosaic.version = 11 : i64} {
  func.func @_down_kernel(%arg0: i32, %arg1: memref<8x2x8x8xf32, #tpu.memory_space<vmem>>, %arg2: memref<4x8xf32, #tpu.memory_space<vmem>>, %arg3: memref<1x8xf32, #tpu.memory_space<vmem>>, %arg4: memref<1x1xf32, #tpu.memory_space<smem>>, %arg5: memref<64x8xf32, #tpu.memory_space<vmem>>) attributes {dimension_semantics = [#tpu.dimension_semantics<parallel>], iteration_bounds = array<i64: 2>, scalar_prefetch = 0 : i64, scratch_operands = 0 : i64, tpu.core_type = #tpu.core_type<tc>, window_params = [{transform_indices = @transform_0, window_bounds = array<i64: 8, 2, 8, 8>}, {pipeline_mode = #tpu.pipeline_mode<synchronous>, transform_indices = @transform_1, window_bounds = array<i64: 4, 8>}, {pipeline_mode = #tpu.pipeline_mode<synchronous>, transform_indices = @transform_2, window_bounds = array<i64: 1, 8>}, {transform_indices = @transform_3, window_bounds = array<i64: 1, 1>}, {transform_indices = @transform_4, window_bounds = array<i64: 64, 8>}]} {
    %c0 = arith.constant 0 : index
    %c0_0 = arith.constant 0 : index
    %c0_1 = arith.constant 0 : index
    %c0_2 = arith.constant 0 : index
    %0 = vector.load %arg1[%c0, %c0_0, %c0_1, %c0_2] : memref<8x2x8x8xf32, #tpu.memory_space<vmem>>, vector<8x2x8x8xf32>
    %1 = vector.extract_strided_slice %0 {offsets = [0, 0, 0, 0], sizes = [8, 1, 8, 8], strides = [1, 1, 1, 1]} : vector<8x2x8x8xf32> to vector<8x1x8x8xf32>
    %2 = vector.shape_cast %1 : vector<8x1x8x8xf32> to vector<8x8x8xf32>
    %3 = vector.extract_strided_slice %0 {offsets = [0, 1, 0, 0], sizes = [8, 1, 8, 8], strides = [1, 1, 1, 1]} : vector<8x2x8x8xf32> to vector<8x1x8x8xf32>
    %4 = vector.shape_cast %3 : vector<8x1x8x8xf32> to vector<8x8x8xf32>
    %5 = arith.maximumf %2, %4 : vector<8x8x8xf32>
    %6 = vector.extract_strided_slice %5 {offsets = [0, 0, 0], sizes = [8, 8, 4], strides = [1, 1, 1]} : vector<8x8x8xf32> to vector<8x8x4xf32>
    %7 = vector.extract_strided_slice %5 {offsets = [0, 0, 4], sizes = [8, 8, 4], strides = [1, 1, 1]} : vector<8x8x8xf32> to vector<8x8x4xf32>
    %8 = arith.maximumf %6, %7 : vector<8x8x4xf32>
    %9 = vector.shape_cast %8 : vector<8x8x4xf32> to vector<64x4xf32>
    %c0_3 = arith.constant 0 : index
    %c0_4 = arith.constant 0 : index
    %10 = vector.load %arg2[%c0_3, %c0_4] : memref<4x8xf32, #tpu.memory_space<vmem>>, vector<4x8xf32>
    %cst = arith.constant dense<0.000000e+00> : vector<64x8xf32>
    %11 = tpu.matmul %9, %10, %cst {dimension_numbers = #tpu.dot_dimension_numbers<[1], [0], [0], [1], [0, 0, 1, 1], [], []>} : vector<64x4xf32>, vector<4x8xf32>, vector<64x8xf32> -> vector<64x8xf32>
    %c0_5 = arith.constant 0 : index
    %c0_6 = arith.constant 0 : index
    %12 = vector.load %arg3[%c0_5, %c0_6] : memref<1x8xf32, #tpu.memory_space<vmem>>, vector<1x8xf32>
    %13 = vector.broadcast %12 : vector<1x8xf32> to vector<64x8xf32>
    %14 = arith.addf %11, %13 : vector<64x8xf32>
    %c0_7 = arith.constant 0 : index
    %c0_8 = arith.constant 0 : index
    %15 = memref.load %arg4[%c0_7, %c0_8] : memref<1x1xf32, #tpu.memory_space<smem>>
    %cst_9 = arith.constant 0.000000e+00 : f32
    %16 = vector.broadcast %cst_9 : f32 to vector<64x8xf32>
    %17 = arith.cmpf oge, %14, %16 : vector<64x8xf32>
    %18 = vector.broadcast %15 : f32 to vector<64x8xf32>
    %19 = arith.mulf %18, %14 : vector<64x8xf32>
    %20 = arith.select %17, %14, %19 : vector<64x8xi1>, vector<64x8xf32>
    %c0_10 = arith.constant 0 : index
    %c0_11 = arith.constant 0 : index
    %21 = vector.load %arg5[%c0_10, %c0_11] : memref<64x8xf32, #tpu.memory_space<vmem>>, vector<64x8xf32>
    tpu.vector_store %arg5[%c0_10, %c0_11], %20 {strides = array<i32>} : memref<64x8xf32, #tpu.memory_space<vmem>>, vector<64x8xf32>,
    return
  }
  func.func @transform_0(%arg0: i32) -> (i32, i32, i32, i32) {
    %c0_i32 = arith.constant 0 : i32
    %c0_i32_0 = arith.constant 0 : i32
    %c0_i32_1 = arith.constant 0 : i32
    %c0_i32_2 = arith.constant 0 : i32
    return %arg0, %c0_i32, %c0_i32_0, %c0_i32_1 : i32, i32, i32, i32
  }
  func.func @transform_1(%arg0: i32) -> (i32, i32) {
    %c0_i32 = arith.constant 0 : i32
    %c0_i32_0 = arith.constant 0 : i32
    %c0_i32_1 = arith.constant 0 : i32
    return %c0_i32, %c0_i32_0 : i32, i32
  }
  func.func @transform_2(%arg0: i32) -> (i32, i32) {
    %c0_i32 = arith.constant 0 : i32
    %c0_i32_0 = arith.constant 0 : i32
    %c0_i32_1 = arith.constant 0 : i32
    return %c0_i32, %c0_i32_0 : i32, i32
  }
  func.func @transform_3(%arg0: i32) -> (i32, i32) {
    %c0_i32 = arith.constant 0 : i32
    %c0_i32_0 = arith.constant 0 : i32
    %c0_i32_1 = arith.constant 0 : i32
    return %c0_i32, %c0_i32_0 : i32, i32
  }
  func.func @transform_4(%arg0: i32) -> (i32, i32) {
    %c0_i32 = arith.constant 0 : i32
    %c0_i32_0 = arith.constant 0 : i32
    return %arg0, %c0_i32 : i32, i32
  }
}

</mosaic_0001>

<bundles_post_ra>
// kernel: tpu_custom_call.1
= control target key start
LH: loop header
LB: loop body
LE: loop exit
PB: predicated region body
PF: predicated region fallthrough
CT: control target
= control target key end

     0   :  { %s596_s17 = smov 0   ;;  %s649_s0 = inlined_call_operand.vmem [shape: f32[16,2,8,8], index: 0, kind: input, shape index: {}]   ;;  %s650_s1 = inlined_call_operand.vmem [shape: f32[4,8], index: 1, kind: input, shape index: {}]   ;;  %s651_s2 = inlined_call_operand.vmem [shape: f32[1,8], index: 2, kind: input, shape index: {}]   ;;  %s652_s3 = inlined_call_operand.<no memory space> [shape: f32[1,1], index: 3, kind: input, shape index: {}]   ;;  %s653_s4 = inlined_call_operand.vmem [shape: f32[128,8], index: 4, kind: output, shape index: {}]  }
   0x1   :  { %9 = sst [smem:[#allocation2]] %s652_s3 }
   0x2 LB: > { %s502_s18 = sadd.s32 4294967295, %s565_s17   ;;  %p506_p0 = scmp.ge.s32.totalorder %s565_s17, 1  ;;  %s565_s17 = sphi %s596_s17, %s15_s17  }
   0x3   : > { %p165_p1 = scmp.lt.s32.totalorder %s565_s17, 3 }
   0x5   : > { %p166_p2 = pnand %p506_p0, %p165_p1 }
   0x6   : > { %s507_s19 = sshll.u32 (!%p166_p2), %s502_s18, 3  ;;  %v269_v0 = vld [vmem:[%s650_s1] sm:$0xf] (!%p166_p2)  ;;  %vm302_vm0 = vcmask (!%p166_p2), 1043456   ;;  %s567_s25 = smov (!%p166_p2), 124   ;;  %vm277_vm1 = vcmask (!%p166_p2), 31744  }
   0x7   : > { %169 = sbr.rel (%p166_p2) target bundleno = 369 (0x171), region = 36  ;;  %p193_p3 = scmp.lt.s32.totalorder (!%p166_p2), %s507_s19, 15  ;;  %534 = vmatprep.subr.msk.mxu0 (!%p166_p2), %vm302_vm0, %v269_v0  ;;  %548 = vmatprep.subr.msk.mxu1 (!%p166_p2), %vm302_vm0, %v269_v0  ;;  %v512_v41 = vld [vmem:[%s651_s2] ss:$0 sm:$0xff] (!%p166_p2)  ;;  %vm437_vm3 = vcmask (!%p166_p2), 64512  }
   0x8   : > { %535 = vmatpush3.msk.msra.mxu0 (!%p166_p2), %vm302_vm0, %v269_v0  ;;  %549 = vmatpush3.msk.msra.mxu1 (!%p166_p2), %vm302_vm0, %v269_v0  ;;  %s411_s26 = sld [smem:[#allocation2]] (!%p166_p2) }
   0xe   : > { %s655_s19 = smov (!%p193_p3, %s507_s19), 15  ;;  %v420_v43 = vstv %s411_s26 }
   0xf   : > { %s524_s3 = sshll.u32 %s655_s19, 4  ;;  %s511_s29 = sshll.u32 %s655_s19, 3 }
  0x10   : > { %s197_s24 = scalar_lea.vmem %s649_s0, %s524_s3  ;;  %s628_s6 = scalar_lea.vmem %s653_s4, %s511_s29 }
  0x11   : > { %v207_v1 = vld [vmem:[%s197_s24 + $0x10] sm:$0xff]  ;;  %v208_v2 = vld [vmem:[%s197_s24 + $0x18] sm:$0xff]  ;;  %v205_v3 = vld [vmem:[%s197_s24] sm:$0xff] }
  0x12   : > { %v222_v4 = vmax.f32 %v207_v1, %v208_v2  ;;  %v206_v5 = vld [vmem:[%s197_s24 + $0x8] sm:$0xff]  ;;  %v215_v6 = vld [vmem:[%s197_s24 + $0x50] sm:$0xff]  ;;  %v216_v7 = vld [vmem:[%s197_s24 + $0x58] sm:$0xff] }
  0x13   : > { %v221_v8 = vmax.f32 %v205_v3, %v206_v5  ;;  %v213_v9 = vld [vmem:[%s197_s24 + $0x40] sm:$0xff]  ;;  %v214_v10 = vld [vmem:[%s197_s24 + $0x48] sm:$0xff]  ;;  %v226_v11 = vmax.f32 %v215_v6, %v216_v7  ;;  %v219_v19 = vld [vmem:[%s197_s24 + $0x70] sm:$0xff] }
  0x14   : > { %239 = vrot.lane.b32.xlu1 %v222_v4, %s567_s25  ;;  %v225_v12 = vmax.f32 %v213_v9, %v214_v10  ;;  %v217_v13 = vld [vmem:[%s197_s24 + $0x60] sm:$0xff]  ;;  %v218_v14 = vld [vmem:[%s197_s24 + $0x68] sm:$0xff]  ;;  %v220_v20 = vld [vmem:[%s197_s24 + $0x78] sm:$0xff] }
  0x15   : > { %237 = vrot.lane.b32.xlu0 %v221_v8, %s567_s25  ;;  %v209_v15 = vld [vmem:[%s197_s24 + $0x20] sm:$0xff]  ;;  %v210_v16 = vld [vmem:[%s197_s24 + $0x28] sm:$0xff]  ;;  %v227_v17 = vmax.f32 %v217_v13, %v218_v14  ;;  %v211_v21 = vld [vmem:[%s197_s24 + $0x30] sm:$0xff]  ;;  %v228_v23 = vmax.f32 %v219_v19, %v220_v20 }
  0x16   : > { %v223_v18 = vmax.f32 %v209_v15, %v210_v16  ;;  %v212_v22 = vld [vmem:[%s197_s24 + $0x38] sm:$0xff] }
  0x17   : > { %v224_v24 = vmax.f32 %v211_v21, %v212_v22 }
  0x18   : > { %247 = vrot.lane.b32.xlu1 %v226_v11, %s567_s25 }
  0x19   : > { %245 = vrot.lane.b32.xlu0 %v225_v12, %s567_s25 }
  0x1c   : > { %249 = vrot.lane.b32.xlu1 %v227_v17, %s567_s25 }
  0x1d   : > { %241 = vrot.lane.b32.xlu0 %v223_v18, %s567_s25 }
  0x20   : > { %251 = vrot.lane.b32.xlu1 %v228_v23, %s567_s25 }
  0x21   : > { %243 = vrot.lane.b32.xlu0 %v224_v24, %s567_s25 }
  0x86   : > { %v240_v25 = vpop.permute.xlu1 %239 }
  0x87   : > { %v262_v26 = vmax.f32 %v222_v4, %v240_v25  ;;  %v238_v27 = vpop.permute.xlu0 %237 }
  0x88   : > { %v261_v28 = vmax.f32 %v221_v8, %v238_v27 }
  0x8a   : > { %536 = vmatprep.mubr.msk.f32.mxu0 %vm277_vm1, %v261_v28  ;;  %v248_v29 = vpop.permute.xlu1 %247 }
  0x8b   : > { %v266_v30 = vmax.f32 %v226_v11, %v248_v29  ;;  %537 = vmatmul.mubr.msk.f32.vlgmr.msra.gmra.mrb[0].mxu0 %vm277_vm1, %v262_v26  ;;  %v246_v31 = vpop.permute.xlu0 %245 }
  0x8c   : > { %v265_v32 = vmax.f32 %v225_v12, %v246_v31 }
  0x8e   : > { %542 = vmatprep.mubr.msk.f32.mxu1 %vm277_vm1, %v265_v32  ;;  %v250_v33 = vpop.permute.xlu1 %249 }
  0x8f   : > { %v267_v34 = vmax.f32 %v227_v17, %v250_v33  ;;  %543 = vmatmul.mubr.msk.f32.vlgmr.msra.gmra.mrb[0].mxu1 %vm277_vm1, %v266_v30  ;;  %v242_v35 = vpop.permute.xlu0 %241 }
  0x90   : > { %v263_v36 = vmax.f32 %v223_v18, %v242_v35 }
  0x91   : > { %545 = vmatprep.mubr.msk.f32.mxu1 %vm277_vm1, %v267_v34 }
  0x92   : > { %539 = vmatprep.mubr.msk.f32.mxu0 %vm277_vm1, %v263_v36  ;;  %v252_v37 = vpop.permute.xlu1 %251 }
  0x93   : > { %v268_v38 = vmax.f32 %v228_v23, %v252_v37  ;;  %v244_v39 = vpop.permute.xlu0 %243 }
  0x94   : > { %v264_v40 = vmax.f32 %v224_v24, %v244_v39 }
  0x95   : > { %546 = vmatmul.mubr.msk.f32.gmra.mrb[2].mxu1 %vm277_vm1, %v268_v38 }
  0x96   : > { %540 = vmatmul.mubr.msk.f32.gmra.mrb[2].mxu0 %vm277_vm1, %v264_v40 }
 0x15e   : > { %v538_v42 = vpop.f32.mrb[0].mxu0 }
 0x15f   : > { %v378_v44 = vadd.f32 %v538_v42, %v512_v41  ;;  %v372_v45 = vpop.f32.mrb[1].mxu0 }
 0x160   : > { %v373_v46 = vadd.f32 %v512_v41, %v372_v45 }
 0x161   : > { %vm413_vm2 = vcmp.ge.f32.partialorder %v378_v44, 0.0  ;;  %v422_v47 = vmul.f32 %v420_v43, %v378_v44 }
 0x162   : > { %vm412_vm4 = vcmp.ge.f32.partialorder %v373_v46, 0.0  ;;  %v421_v48 = vmul.f32 %v420_v43, %v373_v46  ;;  %v544_v49 = vpop.f32.mrb[0].mxu1 }
 0x163   : > { %v430_v50 = vsel %vm413_vm2, %v378_v44, %v422_v47  ;;  %v398_v51 = vadd.f32 %v544_v49, %v512_v41  ;;  %v392_v52 = vpop.f32.mrb[1].mxu1 }
 0x164   : > { %439 = vst.msk [vmem:[%s628_s6 + $0x8] sm:$0xff] %vm437_vm3, %v430_v50  ;;  %v429_v53 = vsel %vm412_vm4, %v373_v46, %v421_v48  ;;  %v393_v54 = vadd.f32 %v512_v41, %v392_v52 }
 0x165   : > { %438 = vst.msk [vmem:[%s628_s6] sm:$0xff] %vm437_vm3, %v429_v53  ;;  %vm417_vm5 = vcmp.ge.f32.partialorder %v398_v51, 0.0  ;;  %v426_v55 = vmul.f32 %v420_v43, %v398_v51 }
 0x166   : > { %vm416_vm6 = vcmp.ge.f32.partialorder %v393_v54, 0.0  ;;  %v425_v56 = vmul.f32 %v420_v43, %v393_v54 }
 0x167   : > { %v434_v57 = vsel %vm417_vm5, %v398_v51, %v426_v55 }
 0x168   : > { %443 = vst.msk [vmem:[%s628_s6 + $0x28] sm:$0xff] %vm437_vm3, %v434_v57  ;;  %v433_v58 = vsel %vm416_vm6, %v393_v54, %v425_v56  ;;  %v547_v59 = vpop.f32.mrb[2].mxu1 }
 0x169   : > { %442 = vst.msk [vmem:[%s628_s6 + $0x20] sm:$0xff] %vm437_vm3, %v433_v58  ;;  %v541_v60 = vpop.f32.mrb[2].mxu0  ;;  %v408_v61 = vadd.f32 %v547_v59, %v512_v41  ;;  %v402_v62 = vpop.f32.mrb[3].mxu1 }
 0x16a   : > { %v388_v63 = vadd.f32 %v541_v60, %v512_v41  ;;  %v382_v0 = vpop.f32.mrb[3].mxu0  ;;  %v403_v1 = vadd.f32 %v512_v41, %v402_v62 }
 0x16b   : > { %vm419_vm7 = vcmp.ge.f32.partialorder %v408_v61, 0.0  ;;  %v428_v2 = vmul.f32 %v420_v43, %v408_v61  ;;  %v383_v3 = vadd.f32 %v512_v41, %v382_v0 }
 0x16c   : > { %vm415_vm8 = vcmp.ge.f32.partialorder %v388_v63, 0.0  ;;  %v424_v4 = vmul.f32 %v420_v43, %v388_v63  ;;  %vm418_vm9 = vcmp.ge.f32.partialorder %v403_v1, 0.0  ;;  %v427_v5 = vmul.f32 %v420_v43, %v403_v1 }
 0x16d   : > { %v436_v6 = vsel %vm419_vm7, %v408_v61, %v428_v2  ;;  %vm414_vm10 = vcmp.ge.f32.partialorder %v383_v3, 0.0  ;;  %v423_v7 = vmul.f32 %v420_v43, %v383_v3 }
 0x16e   : > { %v432_v8 = vsel %vm415_vm8, %v388_v63, %v424_v4  ;;  %445 = vst.msk [vmem:[%s628_s6 + $0x38] sm:$0xff] %vm437_vm3, %v436_v6  ;;  %v435_v9 = vsel %vm418_vm9, %v403_v1, %v427_v5 }
 0x16f   : > { %441 = vst.msk [vmem:[%s628_s6 + $0x18] sm:$0xff] %vm437_vm3, %v432_v8  ;;  %v431_v10 = vsel %vm414_vm10, %v383_v3, %v423_v7  ;;  %444 = vst.msk [vmem:[%s628_s6 + $0x30] sm:$0xff] %vm437_vm3, %v435_v9 }
 0x170   : > { %440 = vst.msk [vmem:[%s628_s6 + $0x10] sm:$0xff] %vm437_vm3, %v431_v10 }
 0x171 PF: > { %s15_s17 = sadd.s32 1, %s565_s17  }
 0x172   : > { %p12_p4 = scmp.ge.s32.totalorder %s15_s17, 4  }
 0x174   :  { %14 = sbr.rel (!%p12_p4) target bundleno = 2 (0x2), region = 66 }

</bundles_post_ra>
